<compile_context>
chip_gen: v7x
topology: tpu7x:2x2x1
jax: 0.10.0
libtpu: 0.0.40
codegen_flags: <defaults>
</compile_context>

<pallas_src>
import functools

import jax
import jax.numpy as jnp
from jax.experimental import pallas as pl
from jax.experimental.pallas import tpu as pltpu

_MiB = 1024 * 1024
_VMEM_BUDGET = 36 * _MiB      # target for the double-buffered working set
_VMEM_LIMIT_CAP = 48 * _MiB   # never request more than this (v7x physical = 64 MiB)


def _round_up(x: int, m: int) -> int:
    return ((x + m - 1) // m) * m


# ----------------------------- kernels ------------------------------------ #

def _proj_kernel(x_ref, w_ref, b_ref, o_ref):
    # x_ref: (tm, K_pad)   streamed patch tile
    # w_ref: (K_pad, D_pad) VMEM-resident weight (constant block index)
    # b_ref: (1, D_pad)    f32 bias (resident)
    # o_ref: (tm, D_pad)
    acc = jnp.dot(x_ref[...], w_ref[...], preferred_element_type=jnp.float32)
    o_ref[...] = (acc + b_ref[...]).astype(o_ref.dtype)


def _proj_kernel_ktiled(x_ref, w_ref, b_ref, o_ref, acc_ref):
    # Fallback for large K: K axis is the innermost ("arbitrary") grid axis.
    k = pl.program_id(1)

    @pl.when(k == 0)
    def _init():
        acc_ref[...] = jnp.zeros_like(acc_ref)

    acc_ref[...] += jnp.dot(x_ref[...], w_ref[...],
                            preferred_element_type=jnp.float32)

    @pl.when(k == pl.num_programs(1) - 1)
    def _finalize():
        o_ref[...] = (acc_ref[...] + b_ref[...]).astype(o_ref.dtype)


# ----------------------------- sizing helpers ------------------------------ #

def _whole_k_ws(tm, K_pad, D_pad, in_isz, out_isz):
    return (2 * tm * K_pad * in_isz        # double-buffered patch tiles
            + 2 * tm * D_pad * out_isz     # double-buffered output tiles
            + 2 * K_pad * D_pad * in_isz   # weight buffers (fetched once)
            + 2 * D_pad * 4)               # bias (f32)


def _ktiled_ws(tm, tk, K_pad, D_pad, in_isz, out_isz):
    return (2 * tm * tk * in_isz
            + 2 * tk * D_pad * in_isz
            + 2 * tm * D_pad * out_isz
            + tm * D_pad * 4               # f32 accumulator scratch
            + 2 * D_pad * 4)


def _vmem_limit(ws):
    return int(min(_VMEM_LIMIT_CAP, max(32 * _MiB, ws + 8 * _MiB)))


# ----------------------------- wrapper ------------------------------------- #

@functools.partial(
    jax.jit,
    static_argnames=("patch_size", "flatten_embedding", "compute_dtype",
                     "out_dtype", "tm", "force_k_tiling"),
)
def patch_embed_pallas(
    x,
    weight,
    bias,
    patch_size,
    flatten_embedding=True,
    *,
    compute_dtype=jnp.bfloat16,  # None -> keep input dtype (exact f32 path)
    out_dtype=None,              # None -> x.dtype (module fidelity); bf16 halves output HBM
    tm=1024,                     # M-tile; auto-shrunk to fit the VMEM budget
    force_k_tiling=False,        # exercise the large-K fallback explicitly
):
    """x: (B, C, H, W); weight: (D, C, pH, pW); bias: (D,). Returns (B, N, D)."""
    B, C, H, W = x.shape
    pH, pW = patch_size
    assert H % pH == 0, f"Input height {H} not a multiple of patch height {pH}"
    assert W % pW == 0, f"Input width {W} not a multiple of patch width {pW}"
    Hp, Wp = H // pH, W // pW
    N = Hp * Wp
    D = weight.shape[0]
    K = C * pH * pW
    M = B * N

    out_dtype = x.dtype if out_dtype is None else out_dtype
    cdt = x.dtype if compute_dtype is None else compute_dtype

    # Cast BEFORE extraction so the materialized (M, K) patch matrix (and its
    # HBM write+read) is in the compute dtype (bf16 by default).
    x = x.astype(cdt)
    # Channel-major flattening (C, pH, pW) matches the flattened Conv2d weight.
    patches = (x.reshape(B, C, Hp, pH, Wp, pW)
                 .transpose(0, 2, 4, 1, 3, 5)
                 .reshape(M, K))
    w_mat = weight.astype(cdt).reshape(D, K).T          # (K, D)
    b_mat = bias.astype(jnp.float32).reshape(1, D)      # bias stays f32

    # Pad K (contraction) and D (lanes) to multiples of 128: unmasked MXU feed
    # and lane-dense unmasked output stores even for small embed dims.
    K_pad = _round_up(K, 128)
    D_pad = _round_up(D, 128)
    if K_pad != K:  # zero-pad contraction in BOTH operands -> result unchanged
        patches = jnp.pad(patches, ((0, 0), (0, K_pad - K)))
        w_mat = jnp.pad(w_mat, ((0, K_pad - K), (0, 0)))
    if D_pad != D:
        w_mat = jnp.pad(w_mat, ((0, 0), (0, D_pad - D)))
        b_mat = jnp.pad(b_mat, ((0, 0), (0, D_pad - D)))

    in_isz = jnp.dtype(cdt).itemsize
    out_isz = jnp.dtype(out_dtype).itemsize

    # ---- whole-K path sizing: weight resident, 1-D grid over M ----
    tm_eff = max(8, min(_round_up(tm, 8), _round_up(M, 8)))
    while tm_eff > 8 and _whole_k_ws(tm_eff, K_pad, D_pad, in_isz, out_isz) > _VMEM_BUDGET:
        tm_eff = max(8, _round_up(tm_eff // 2, 8))

    min_tm = min(256, max(8, _round_up(M, 8)))
    whole_k_ok = (
        (not force_k_tiling)
        and tm_eff >= min_tm
        and _whole_k_ws(tm_eff, K_pad, D_pad, in_isz, out_isz) <= _VMEM_BUDGET
    )

    if whole_k_ok:
        ws = _whole_k_ws(tm_eff, K_pad, D_pad, in_isz, out_isz)
        out = pl.pallas_call(
            _proj_kernel,
            out_shape=jax.ShapeDtypeStruct((M, D_pad), out_dtype),
            grid_spec=pltpu.PrefetchScalarGridSpec(
                num_scalar_prefetch=0,
                grid=(pl.cdiv(M, tm_eff),),
                in_specs=[
                    pl.BlockSpec((tm_eff, K_pad), lambda i: (i, 0)),  # streamed patches
                    pl.BlockSpec((K_pad, D_pad), lambda i: (0, 0)),   # resident weight
                    pl.BlockSpec((1, D_pad), lambda i: (0, 0)),       # resident bias
                ],
                out_specs=pl.BlockSpec((tm_eff, D_pad), lambda i: (i, 0)),
            ),
            compiler_params=pltpu.CompilerParams(
                dimension_semantics=("parallel",),
                vmem_limit_bytes=_vmem_limit(ws),
            ),
        )(patches, w_mat, b_mat)
    else:
        # ---- K-tiled fallback for large K (f32 accumulator, K innermost) ----
        # tk must be a multiple of 128 that divides K_pad so every K block is
        # fully valid (no garbage enters the contraction).
        q = K_pad // 128
        tm_kt = max(8, min(_round_up(tm, 8), _round_up(M, 8)))
        divisors = sorted((128 * d for d in range(1, q + 1) if q % d == 0),
                          reverse=True)
        tk = 128
        for cand in divisors:
            if _ktiled_ws(tm_kt, cand, K_pad, D_pad, in_isz, out_isz) <= _VMEM_BUDGET:
                tk = cand
                break
        while tm_kt > 8 and _ktiled_ws(tm_kt, tk, K_pad, D_pad, in_isz, out_isz) > _VMEM_BUDGET:
            tm_kt = max(8, _round_up(tm_kt // 2, 8))
        ws = _ktiled_ws(tm_kt, tk, K_pad, D_pad, in_isz, out_isz)

        out = pl.pallas_call(
            _proj_kernel_ktiled,
            out_shape=jax.ShapeDtypeStruct((M, D_pad), out_dtype),
            grid_spec=pltpu.PrefetchScalarGridSpec(
                num_scalar_prefetch=0,
                grid=(pl.cdiv(M, tm_kt), pl.cdiv(K_pad, tk)),
                in_specs=[
                    pl.BlockSpec((tm_kt, tk), lambda i, k: (i, k)),
                    pl.BlockSpec((tk, D_pad), lambda i, k: (k, 0)),
                    pl.BlockSpec((1, D_pad), lambda i, k: (0, 0)),
                ],
                out_specs=pl.BlockSpec((tm_kt, D_pad), lambda i, k: (i, 0)),
                scratch_shapes=[pltpu.VMEM((tm_kt, D_pad), jnp.float32)],
            ),
            compiler_params=pltpu.CompilerParams(
                dimension_semantics=("parallel", "arbitrary"),
                vmem_limit_bytes=_vmem_limit(ws),
            ),
        )(patches, w_mat, b_mat)

    out = out[:, :D].reshape(B, N, D)
    if not flatten_embedding:
        out = out.reshape(B, Hp, Wp, D)
    # norm_layer=None in the reference config -> nn.Identity (no-op).
    return out


if __name__ == "__main__":
    # Small config consistent with the module's forward:
    # img_size=16, patch_size=8, in_chans=4, embed_dim=32, batch=2
    B, C, H, W = 2, 4, 16, 16
    pH, pW = 8, 8
    D = 32

    key = jax.random.PRNGKey(0)
    kx, kw, kb = jax.random.split(key, 3)

    x = jax.random.normal(kx, (B, C, H, W), dtype=jnp.float32)
    weight = jax.random.normal(kw, (D, C, pH, pW), dtype=jnp.float32) * 0.02
    bias = jax.random.normal(kb, (D,), dtype=jnp.float32) * 0.02

    # Pure-JAX reference (same math as nn.Conv2d with stride == kernel_size).
    Hp, Wp = H // pH, W // pW
    ref_patches = (x.reshape(B, C, Hp, pH, Wp, pW)
                   .transpose(0, 2, 4, 1, 3, 5)
                   .reshape(B * Hp * Wp, C * pH * pW))
    ref = (ref_patches @ weight.reshape(D, -1).T + bias).reshape(B, Hp * Wp, D)

    # (1) exact-dtype (f32) path — matches the f32 PyTorch module closely.
    out_f32 = jax.block_until_ready(
        patch_embed_pallas(x, weight, bias, (pH, pW), compute_dtype=None))
    assert out_f32.shape == (B, Hp * Wp, D)
    assert jnp.allclose(out_f32, ref, atol=1e-4, rtol=1e-4)

    # (2) default bf16-MXU path (looser tolerance: expected precision change).
    out_bf16 = jax.block_until_ready(
        patch_embed_pallas(x, weight, bias, (pH, pW)))
    assert out_bf16.shape == (B, Hp * Wp, D)
    assert jnp.allclose(out_bf16, ref, atol=3e-2, rtol=3e-2)

    # (3) K-tiled fallback path (forced at small K just to verify it runs).
    out_kt = jax.block_until_ready(
        patch_embed_pallas(x, weight, bias, (pH, pW), compute_dtype=None,
                           force_k_tiling=True))
    assert jnp.allclose(out_kt, ref, atol=1e-4, rtol=1e-4)

    print("KERNEL_OK")
</pallas_src>

<mosaic_0001>
module attributes {stable_mosaic.version = 11 : i64} {
  func.func @_proj_kernel(%arg0: i32, %arg1: memref<8x256xf32, #tpu.memory_space<vmem>>, %arg2: memref<256x128xf32, #tpu.memory_space<vmem>>, %arg3: memref<1x128xf32, #tpu.memory_space<vmem>>, %arg4: memref<8x128xf32, #tpu.memory_space<vmem>>) attributes {dimension_semantics = [#tpu.dimension_semantics<parallel>], iteration_bounds = array<i64: 1>, scalar_prefetch = 0 : i64, scratch_operands = 0 : i64, tpu.core_type = #tpu.core_type<tc>, window_params = [{transform_indices = @transform_0, window_bounds = array<i64: 8, 256>}, {pipeline_mode = #tpu.pipeline_mode<synchronous>, transform_indices = @transform_1, window_bounds = array<i64: 256, 128>}, {pipeline_mode = #tpu.pipeline_mode<synchronous>, transform_indices = @transform_2, window_bounds = array<i64: 1, 128>}, {transform_indices = @transform_3, window_bounds = array<i64: 8, 128>}]} {
    %c0 = arith.constant 0 : index
    %c0_0 = arith.constant 0 : index
    %0 = vector.load %arg1[%c0, %c0_0] : memref<8x256xf32, #tpu.memory_space<vmem>>, vector<8x256xf32>
    %c0_1 = arith.constant 0 : index
    %c0_2 = arith.constant 0 : index
    %1 = vector.load %arg2[%c0_1, %c0_2] : memref<256x128xf32, #tpu.memory_space<vmem>>, vector<256x128xf32>
    %cst = arith.constant dense<0.000000e+00> : vector<8x128xf32>
    %2 = tpu.matmul %0, %1, %cst {dimension_numbers = #tpu.dot_dimension_numbers<[1], [0], [0], [1], [0, 0, 1, 1], [], []>} : vector<8x256xf32>, vector<256x128xf32>, vector<8x128xf32> -> vector<8x128xf32>
    %c0_3 = arith.constant 0 : index
    %c0_4 = arith.constant 0 : index
    %3 = vector.load %arg3[%c0_3, %c0_4] : memref<1x128xf32, #tpu.memory_space<vmem>>, vector<1x128xf32>
    %4 = vector.broadcast %3 : vector<1x128xf32> to vector<8x128xf32>
    %5 = arith.addf %2, %4 : vector<8x128xf32>
    %c0_5 = arith.constant 0 : index
    %c0_6 = arith.constant 0 : index
    %6 = vector.load %arg4[%c0_5, %c0_6] : memref<8x128xf32, #tpu.memory_space<vmem>>, vector<8x128xf32>
    tpu.vector_store %arg4[%c0_5, %c0_6], %5 {strides = array<i32>} : memref<8x128xf32, #tpu.memory_space<vmem>>, vector<8x128xf32>,
    return
  }
  func.func @transform_0(%arg0: i32) -> (i32, i32) {
    %c0_i32 = arith.constant 0 : i32
    %c0_i32_0 = arith.constant 0 : i32
    return %arg0, %c0_i32 : i32, i32
  }
  func.func @transform_1(%arg0: i32) -> (i32, i32) {
    %c0_i32 = arith.constant 0 : i32
    %c0_i32_0 = arith.constant 0 : i32
    %c0_i32_1 = arith.constant 0 : i32
    return %c0_i32, %c0_i32_0 : i32, i32
  }
  func.func @transform_2(%arg0: i32) -> (i32, i32) {
    %c0_i32 = arith.constant 0 : i32
    %c0_i32_0 = arith.constant 0 : i32
    %c0_i32_1 = arith.constant 0 : i32
    return %c0_i32, %c0_i32_0 : i32, i32
  }
  func.func @transform_3(%arg0: i32) -> (i32, i32) {
    %c0_i32 = arith.constant 0 : i32
    %c0_i32_0 = arith.constant 0 : i32
    return %arg0, %c0_i32 : i32, i32
  }
}

</mosaic_0001>

<bundles_post_ra>
// kernel: patch_embed_pallas.1
= control target key start
LH: loop header
LB: loop body
LE: loop exit
PB: predicated region body
PF: predicated region fallthrough
CT: control target
= control target key end

     0   :  { %s372_s0 = inlined_call_operand.vmem [shape: f32[8,256], index: 0, kind: input, shape index: {}]   ;;  %s373_s1 = inlined_call_operand.vmem [shape: f32[256,128], index: 1, kind: input, shape index: {}]   ;;  %s374_s2 = inlined_call_operand.vmem [shape: f32[1,128], index: 2, kind: input, shape index: {}]   ;;  %s375_s3 = inlined_call_operand.hbm [shape: f32[8,128], index: 3, kind: output, shape index: {}]  }
   0x1   :  { %v33_v0 = vld [vmem:[%s373_s1 + $0x80] sm:$0xff]  ;;  %v34_v1 = vld [vmem:[%s373_s1 + $0x88] sm:$0xff]  ;;  %v35_v5 = vld [vmem:[%s373_s1 + $0x90] sm:$0xff] }
   0x2   :  { %v17_v2 = vld [vmem:[%s373_s1] sm:$0xff]  ;;  %v177_v3 = vpack.c.bf16 %v34_v1, %v33_v0  ;;  %v18_v4 = vld [vmem:[%s373_s1 + $0x8] sm:$0xff]  ;;  %v36_v6 = vld [vmem:[%s373_s1 + $0x98] sm:$0xff] }
   0x3   :  { %v179_v7 = vpack.c.bf16 %v18_v4, %v17_v2  ;;  %v181_v8 = vpack.c.bf16 %v36_v6, %v35_v5  ;;  %v19_v9 = vld [vmem:[%s373_s1 + $0x10] sm:$0xff]  ;;  %v20_v10 = vld [vmem:[%s373_s1 + $0x18] sm:$0xff]  ;;  %v37_v11 = vld [vmem:[%s373_s1 + $0xa0] sm:$0xff] }
   0x4   :  { %178 = vmatprep.subr.bf16.mxu0 %v177_v3  ;;  %v38_v12 = vld [vmem:[%s373_s1 + $0xa8] sm:$0xff]  ;;  %v183_v13 = vpack.c.bf16 %v20_v10, %v19_v9  ;;  %v21_v15 = vld [vmem:[%s373_s1 + $0x20] sm:$0xff]  ;;  %v39_v17 = vld [vmem:[%s373_s1 + $0xb0] sm:$0xff] }
   0x5   :  { %180 = vmatpush3.bf16.msra.mxu0 %v179_v7  ;;  %v185_v14 = vpack.c.bf16 %v38_v12, %v37_v11  ;;  %v22_v16 = vld [vmem:[%s373_s1 + $0x28] sm:$0xff]  ;;  %v40_v18 = vld [vmem:[%s373_s1 + $0xb8] sm:$0xff]  ;;  %v23_v21 = vld [vmem:[%s373_s1 + $0x30] sm:$0xff] }
   0x6   :  { %182 = vmatprep.subr.bf16.mxu0 %v181_v8  ;;  %v187_v19 = vpack.c.bf16 %v22_v16, %v21_v15  ;;  %v189_v20 = vpack.c.bf16 %v40_v18, %v39_v17  ;;  %v24_v22 = vld [vmem:[%s373_s1 + $0x38] sm:$0xff]  ;;  %v41_v23 = vld [vmem:[%s373_s1 + $0xc0] sm:$0xff]  ;;  %v42_v24 = vld [vmem:[%s373_s1 + $0xc8] sm:$0xff] }
   0x7   :  { %v16_v25 = vld [vmem:[%s372_s0 + $0x8] sm:$0xff] }
   0x8   :  { %120 = vmatprep.mubr.f32.mxu0 %v16_v25 }
   0x9   :  { %184 = vmatpush3.bf16.msra.mxu0 %v183_v13 }
   0xa   :  { %186 = vmatprep.subr.bf16.mxu0 %v185_v14 }
   0xb   :  { %8 = vsyncpa [#allocation3], 0  ;;  %v191_v26 = vpack.c.bf16 %v24_v22, %v23_v21  ;;  %v193_v27 = vpack.c.bf16 %v42_v24, %v41_v23  ;;  %v25_v28 = vld [vmem:[%s373_s1 + $0x40] sm:$0xff]  ;;  %v26_v29 = vld [vmem:[%s373_s1 + $0x48] sm:$0xff]  ;;  %s234_s28 = smov [#allocation2]  }
   0xc   :  { %v43_v30 = vld [vmem:[%s373_s1 + $0xd0] sm:$0xff]  ;;  %v44_v31 = vld [vmem:[%s373_s1 + $0xd8] sm:$0xff]  ;;  %v195_v32 = vpack.c.bf16 %v26_v29, %v25_v28  ;;  %v45_v36 = vld [vmem:[%s373_s1 + $0xe0] sm:$0xff]  ;;  %s133_s29 = sshll.u32 %s234_s28, 4  ;;  %s134_s29 = int_to_ptr.vmem [resolvable:$true] %s133_s29 }
   0xd   :  { %188 = vmatpush3.bf16.msra.mxu0 %v187_v19  ;;  %v197_v33 = vpack.c.bf16 %v44_v31, %v43_v30  ;;  %v27_v34 = vld [vmem:[%s373_s1 + $0x50] sm:$0xff]  ;;  %v28_v35 = vld [vmem:[%s373_s1 + $0x58] sm:$0xff]  ;;  %v46_v37 = vld [vmem:[%s373_s1 + $0xe8] sm:$0xff]  ;;  %p215_p1 = scmp.lt.s32.totalorder %s134_s29, %s134_s29 }
   0xe   :  { %190 = vmatprep.subr.bf16.mxu0 %v189_v20  ;;  %v199_v38 = vpack.c.bf16 %v28_v35, %v27_v34  ;;  %v201_v39 = vpack.c.bf16 %v46_v37, %v45_v36  ;;  %v29_v40 = vld [vmem:[%s373_s1 + $0x60] sm:$0xff]  ;;  %v30_v41 = vld [vmem:[%s373_s1 + $0x68] sm:$0xff]  ;;  %v47_v42 = vld [vmem:[%s373_s1 + $0xf0] sm:$0xff] }
   0xf   :  { %v48_v43 = vld [vmem:[%s373_s1 + $0xf8] sm:$0xff]  ;;  %v203_v44 = vpack.c.bf16 %v30_v41, %v29_v40  ;;  %v31_v46 = vld [vmem:[%s373_s1 + $0x70] sm:$0xff]  ;;  %v15_v49 = vld [vmem:[%s372_s0] sm:$0xff] }
  0x10   :  { %v205_v45 = vpack.c.bf16 %v48_v43, %v47_v42  ;;  %v32_v47 = vld [vmem:[%s373_s1 + $0x78] sm:$0xff]  ;;  %v141_v52 = vld [vmem:[%s374_s2] ss:$0 sm:$0xff]  ;;  %s210_s1 = scalar_lea.vmem %s134_s29, 128 }
  0x11   :  { %192 = vmatpush3.bf16.msra.mxu0 %v191_v26  ;;  %v207_v48 = vpack.c.bf16 %v32_v47, %v31_v46  ;;  %p211_p0 = scmp.ne.s32.totalorder %s134_s29, %s210_s1  ;;  %p216_p2 = scmp.lt.s32.totalorder %s210_s1, %s210_s1 }
  0x12   :  { %194 = vmatprep.subr.bf16.mxu0 %v193_v27 }
  0x13   :  { %p217_p3 = por %p216_p2, %p215_p1 }
  0x15   :  { %196 = vmatpush3.bf16.msra.mxu0 %v195_v32  ;;  %p218_p4 = pnand %p217_p3, %p211_p0 }
  0x16   :  { %198 = vmatprep.subr.bf16.mxu0 %v197_v33 }
  0x19   :  { %200 = vmatpush3.bf16.msra.mxu0 %v199_v38 }
  0x1a   :  { %202 = vmatprep.subr.bf16.mxu0 %v201_v39 }
  0x1d   :  { %204 = vmatpush3.bf16.msra.mxu0 %v203_v44 }
  0x1e   :  { %206 = vmatprep.subr.bf16.mxu0 %v205_v45 }
  0x21   :  { %208 = vmatpush3.bf16.msra.mxu0 %v207_v48 }
  0x24   :  { %121 = vmatmul.mubr.f32.vlgmr.msra.gmra.mrb[0].mxu0 %v15_v49 }
  0xf7   :  { %v174_v50 = vpop.f32.mrb[0].mxu0 }
  0xf8   :  { %v175_v51 = vpop.f32.mrb[1].mxu0 }
  0xf9   :  { %v176_v53 = vadd.f32 %v175_v51, %v174_v50 }
  0xfb   :  { %v123_v54 = vadd.f32 %v176_v53, %v141_v52 }
  0xfd   :  { %126 = vst [vmem:[#allocation2] sm:$0xff] %v123_v54 }
  0xfe   :  { %221 = shalt.err (!%p218_p4)
}
  0xff   :  { %s222_s4 = scalar_lea.hbm %s375_s3, 128 }
 0x100   :  { %p223_p5 = scmp.ne.s32.totalorder %s375_s3, %s222_s4  ;;  %p226_p6 = scmp.lt.u32.totalorder %s222_s4, %s375_s3 }
 0x102   :  { %p228_p7 = pnand %p226_p6, %p223_p5 }
 0x104   :  { %231 = shalt.err (!%p228_p7)
}
 0x105   :  { %136 = dma.vmem_to_hbm [thread:$0]  %s134_s29, 128, %s375_s3, [#allocation3]  }
 0x106   :  { %232 = dma.done.wait [#allocation3], 128  }
 0x107   :  { %233 = vsyncadd [#allocation3], 4294967168 }
 0x108   :  { %140 = vsyncpa [#allocation3], 1 }

</bundles_post_ra>
